<compile_context>
chip_gen: v7x
topology: tpu7x:2x2x1
jax: 0.10.0
libtpu: 0.0.40
codegen_flags: <defaults>
</compile_context>

<pallas_src>
import math

import jax
import jax.numpy as jnp
from jax.experimental import pallas as pl
from jax.experimental.pallas import tpu as pltpu

LEAKY_SLOPE = 0.01  # torch.nn.LeakyReLU default negative_slope
LANE = 128


def _round_up(x, m):
    return ((x + m - 1) // m) * m


def _leaky_relu(v):
    return jnp.where(v >= 0, v, LEAKY_SLOPE * v)


def _tail(h_lin, b1, w11_ref, b11_ref, w2_ref, b2_ref, w3_ref, b3_ref,
          out_dtype):
    """Layers 1 (bias+act) .. 4, given the layer-1 matmul result (f32 [tb, 2*hdim])."""
    cdt = w11_ref.dtype  # MXU operand dtype (bf16 by default)
    h = _leaky_relu(h_lin + b1)
    h = _leaky_relu(
        jnp.dot(h.astype(cdt), w11_ref[...],
                preferred_element_type=jnp.float32) + b11_ref[...])
    h = _leaky_relu(
        jnp.dot(h.astype(cdt), w2_ref[...],
                preferred_element_type=jnp.float32) + b2_ref[...])
    # Final Linear(10 -> 1): lane-sparse, keep it off the MXU.  w3 is a
    # zero-padded [1, 128] row so padded columns contribute exactly 0.
    z = jnp.sum(h * w3_ref[...], axis=-1, keepdims=True) + b3_ref[...]
    return jax.nn.sigmoid(z).astype(out_dtype)


# --------------------------------------------------------------------------
# Kernel bodies
# --------------------------------------------------------------------------
def _d_kernel_fused(x_ref, w1_ref, b1_ref, w11_ref, b11_ref,
                    w2_ref, b2_ref, w3_ref, b3_ref, o_ref):
    """Grid = (batch tiles,).  w1 fully resident, whole K in one dot."""
    h_lin = jnp.dot(x_ref[...], w1_ref[...], preferred_element_type=jnp.float32)
    o_ref[...] = _tail(h_lin, b1_ref[...], w11_ref, b11_ref,
                       w2_ref, b2_ref, w3_ref, b3_ref, o_ref.dtype)


def _make_kslice_kernel(tk):
    """Grid = (batch tiles [parallel], K tiles [arbitrary]).  w1 resident,
    K chunk sliced in-kernel -> w1 is DMA'd from HBM exactly once."""
    def kernel(x_ref, w1_ref, b1_ref, w11_ref, b11_ref,
               w2_ref, b2_ref, w3_ref, b3_ref, o_ref, acc_ref):
        k = pl.program_id(1)

        @pl.when(k == 0)
        def _():
            acc_ref[...] = jnp.zeros_like(acc_ref)

        start = pl.multiple_of(k * tk, LANE)
        acc_ref[...] += jnp.dot(x_ref[...], w1_ref[pl.ds(start, tk), :],
                                preferred_element_type=jnp.float32)

        @pl.when(k == pl.num_programs(1) - 1)
        def _():
            o_ref[...] = _tail(acc_ref[...], b1_ref[...], w11_ref, b11_ref,
                               w2_ref, b2_ref, w3_ref, b3_ref, o_ref.dtype)
    return kernel


def _make_wstream_kernel(tb, h1):
    """Grid = (K tiles OUTER, batch tiles inner), w1 streamed in K blocks.
    Because the w1 block index only depends on the outer axis, each block is
    fetched exactly once; a persistent (B_pad, 2*hdim) f32 accumulator holds
    all batch tiles across the K sweep.  Output block has a constant index so
    it is written back to HBM only once, at the end of the grid."""
    def kernel(x_ref, w1_ref, b1_ref, w11_ref, b11_ref,
               w2_ref, b2_ref, w3_ref, b3_ref, o_ref, acc_ref):
        k = pl.program_id(0)
        i = pl.program_id(1)
        rows = pl.ds(pl.multiple_of(i * tb, 8), tb)

        @pl.when(k == 0)
        def _():
            acc_ref[rows, :] = jnp.zeros((tb, h1), jnp.float32)

        acc_ref[rows, :] += jnp.dot(x_ref[...], w1_ref[...],
                                    preferred_element_type=jnp.float32)

        @pl.when(k == pl.num_programs(0) - 1)
        def _():
            o_ref[rows, :] = _tail(acc_ref[rows, :], b1_ref[...],
                                   w11_ref, b11_ref, w2_ref, b2_ref,
                                   w3_ref, b3_ref, o_ref.dtype)
    return kernel


# --------------------------------------------------------------------------
# Host-side wrapper
# --------------------------------------------------------------------------
def _vmem_budget_bytes():
    """Usable per-core VMEM: leave ~16 MiB headroom for Mosaic internals,
    cap at 100 MiB on 128 MiB parts (v5e/v6e), ~48 MiB on v7x (64 MiB)."""
    cap = 64 * 2 ** 20
    try:
        cap = int(pltpu.get_tpu_info().vmem_capacity_bytes)
    except Exception:
        pass
    return int(min(100 * 2 ** 20, max(24 * 2 ** 20, cap - 16 * 2 ** 20)))


def d_forward(x, params, *, tb=None, tk=None, w1_resident=None,
              compute_dtype=jnp.bfloat16):
    """D forward pass.  compute_dtype controls the MXU operand dtype for all
    matmuls (accumulation is always f32); pass jnp.float32 for an exact path.
    tb / tk / w1_resident are tuning overrides (auto-selected by default)."""
    B, indim = x.shape
    (w1, b1), (w11, b11), (w2, b2), (w3, b3) = params
    h1 = w1.shape[1]   # 2*hdim
    hd = w11.shape[1]  # hdim
    n2 = w2.shape[1]   # 10

    cdt = jnp.dtype(compute_dtype)
    isz = cdt.itemsize
    budget = _vmem_budget_bytes()

    # ---- lane-pad the 10-wide tail (exact: padded columns stay 0) ----------
    npad = _round_up(max(n2, LANE), LANE)
    w2p = jnp.pad(w2, ((0, 0), (0, npad - n2)))
    b2p = jnp.pad(b2, ((0, 0), (0, npad - n2)))
    w3row = jnp.pad(w3.reshape(1, n2), ((0, 0), (0, npad - n2)))
    tail_bytes = ((w11.size + w2p.size) * isz
                  + (b1.size + b11.size + b2p.size + w3row.size + b3.size) * 4)

    # ---- batch tile ---------------------------------------------------------
    if tb is None:
        tb = min(1024, _round_up(B, 16))
    tb = _round_up(int(tb), 16 if isz < 4 else 8)

    # ---- normalize a user-provided K tile -----------------------------------
    if tk is not None:
        tk = min(_round_up(int(tk), LANE), _round_up(indim, LANE))
        if tk >= indim:
            tk = None  # whole K: handled by the fused path below

    # ---- path selection ------------------------------------------------------
    # "fused": w1 resident (single-buffered) + whole-K x tile (double-buffered).
    use_fused = False
    if tk is None and w1_resident is not False:
        for cand in [c for c in (tb, 512, 256, 128) if c <= tb] or [tb]:
            fb = 2 * cand * indim * isz + indim * h1 * isz + tail_bytes + 2 * cand * 4
            if fb <= 0.9 * budget:
                tb = cand
                use_fused = True
                break

    B_pad = _round_up(B, tb)
    nbt = B_pad // tb

    if not use_fused:
        def _stream_bytes(tk_, resident):
            kp = _round_up(indim, tk_)
            fb = 2 * tb * tk_ * isz + tail_bytes + 2 * tb * 4
            if resident:
                fb += kp * h1 * isz + tb * h1 * 4          # resident w1 + acc
            else:
                fb += 2 * tk_ * h1 * isz + B_pad * h1 * 4 + B_pad * 4
            return fb

        if w1_resident is None:
            w1_resident = _stream_bytes(tk if tk is not None else 512, True) <= 0.9 * budget
        if tk is None:
            tk = 512
            for c in (2048, 1024):
                if indim % c == 0 and _stream_bytes(c, w1_resident) <= 0.9 * budget:
                    tk = c
                    break
            while tk > LANE and _stream_bytes(tk, w1_resident) > 0.9 * budget:
                tk //= 2
        indim_pad = _round_up(indim, tk)
        nk = indim_pad // tk

    # ---- pad & cast operands -------------------------------------------------
    if use_fused:
        kdim = indim
        x_p = x if B_pad == B else jnp.pad(x, ((0, B_pad - B), (0, 0)))
        w1_p = w1
    else:
        kdim = indim_pad
        x_p = jnp.pad(x, ((0, B_pad - B), (0, indim_pad - indim)))
        w1_p = jnp.pad(w1, ((0, indim_pad - indim), (0, 0)))

    x_c = x_p.astype(cdt)
    w1_c = w1_p.astype(cdt)
    w11_c = w11.astype(cdt)
    w2p_c = w2p.astype(cdt)
    b1_f, b11_f, b2p_f, b3_f, w3_f = (a.astype(jnp.float32)
                                      for a in (b1, b11, b2p, b3, w3row))

    # Resident operands: constant block index, single pipeline buffer.
    def _resident(arr, ngrid):
        if ngrid == 1:
            imap = lambda i: (0, 0)
        else:
            imap = lambda i, k: (0, 0)
        return pl.BlockSpec(arr.shape, imap, pipeline_mode=pl.Buffered(1))

    if use_fused:
        grid = (nbt,)
        dims = ("parallel",)
        kernel = _d_kernel_fused
        in_specs = [
            pl.BlockSpec((tb, indim), lambda i: (i, 0)),
            _resident(w1_c, 1), _resident(b1_f, 1),
            _resident(w11_c, 1), _resident(b11_f, 1),
            _resident(w2p_c, 1), _resident(b2p_f, 1),
            _resident(w3_f, 1), _resident(b3_f, 1),
        ]
        out_specs = pl.BlockSpec((tb, 1), lambda i: (i, 0))
        scratch = []
    elif w1_resident:
        grid = (nbt, nk)
        dims = ("parallel", "arbitrary")
        kernel = _make_kslice_kernel(tk)
        in_specs = [
            pl.BlockSpec((tb, tk), lambda i, k: (i, k)),
            _resident(w1_c, 2), _resident(b1_f, 2),
            _resident(w11_c, 2), _resident(b11_f, 2),
            _resident(w2p_c, 2), _resident(b2p_f, 2),
            _resident(w3_f, 2), _resident(b3_f, 2),
        ]
        out_specs = pl.BlockSpec((tb, 1), lambda i, k: (i, 0))
        scratch = [pltpu.VMEM((tb, h1), jnp.float32)]
    else:
        # K outer so each streamed w1 block is fetched exactly once; the
        # constant-index output block and full-batch accumulator require a
        # single core, so both grid axes are "arbitrary".
        grid = (nk, nbt)
        dims = ("arbitrary", "arbitrary")
        kernel = _make_wstream_kernel(tb, h1)
        in_specs = [
            pl.BlockSpec((tb, tk), lambda k, i: (i, k)),
            pl.BlockSpec((tk, h1), lambda k, i: (k, 0)),
            _resident(b1_f, 2),
            _resident(w11_c, 2), _resident(b11_f, 2),
            _resident(w2p_c, 2), _resident(b2p_f, 2),
            _resident(w3_f, 2), _resident(b3_f, 2),
        ]
        out_specs = pl.BlockSpec((B_pad, 1), lambda k, i: (0, 0))
        scratch = [pltpu.VMEM((B_pad, h1), jnp.float32)]

    flops = 2 * B_pad * (kdim * h1 + h1 * hd + hd * npad + npad)
    bytes_accessed = (x_c.size * isz + w1_c.size * isz
                      + (w11_c.size + w2p_c.size) * isz
                      + (b1_f.size + b11_f.size + b2p_f.size
                         + w3_f.size + b3_f.size) * 4
                      + B_pad * 4)
    cost = pl.CostEstimate(flops=int(flops), transcendentals=int(B_pad),
                           bytes_accessed=int(bytes_accessed))

    out = pl.pallas_call(
        kernel,
        out_shape=jax.ShapeDtypeStruct((B_pad, 1), jnp.float32),
        grid_spec=pltpu.PrefetchScalarGridSpec(
            num_scalar_prefetch=0,
            grid=grid,
            in_specs=in_specs,
            out_specs=out_specs,
            scratch_shapes=scratch,
        ),
        compiler_params=pltpu.CompilerParams(
            dimension_semantics=dims,
            vmem_limit_bytes=int(budget)),
        cost_estimate=cost,
    )(x_c, w1_c, b1_f, w11_c, b11_f, w2p_c, b2p_f, w3_f, b3_f)
    return out[:B]


# --------------------------------------------------------------------------
# Params / reference
# --------------------------------------------------------------------------
def init_params(key, indim, hdim=128):
    """Deterministic init mirroring the PyTorch module.

    Weights: kaiming_uniform_ (a=0, fan_in, leaky_relu) -> U(+-sqrt(6/fan_in)).
    Biases:  PyTorch Linear default -> U(+-1/sqrt(fan_in)).
    Stored as W[in, out] (transposed vs. PyTorch) and b[1, out].
    """
    dims = [(indim, 2 * hdim), (2 * hdim, hdim), (hdim, 10), (10, 1)]
    params = []
    for (fan_in, fan_out) in dims:
        key, kw, kb = jax.random.split(key, 3)
        w_bound = math.sqrt(6.0 / fan_in)
        b_bound = 1.0 / math.sqrt(fan_in)
        w = jax.random.uniform(kw, (fan_in, fan_out), jnp.float32,
                               -w_bound, w_bound)
        b = jax.random.uniform(kb, (1, fan_out), jnp.float32,
                               -b_bound, b_bound)
        params.append((w, b))
    return params


def d_forward_ref(x, params):
    """Pure-JAX f32 reference for correctness checking."""
    (w1, b1), (w11, b11), (w2, b2), (w3, b3) = params
    h = _leaky_relu(x @ w1 + b1)
    h = _leaky_relu(h @ w11 + b11)
    h = _leaky_relu(h @ w2 + b2)
    return jax.nn.sigmoid(h @ w3 + b3)


if __name__ == "__main__":
    key = jax.random.PRNGKey(0)
    kx, kp = jax.random.split(key)

    B, indim, hdim = 16, 256, 64
    x = jax.random.normal(kx, (B, indim), jnp.float32)
    params = init_params(kp, indim, hdim=hdim)
    ref = d_forward_ref(x, params)

    # 1) Fused path (w1 resident, no K axis), f32 compute -> tight check.
    out = jax.block_until_ready(d_forward(x, params, compute_dtype=jnp.float32))
    assert out.shape == (B, 1)
    assert jnp.allclose(out, ref, atol=1e-4, rtol=1e-4), "fused f32 mismatch"

    # 2) K-streamed x with resident w1 (in-kernel pl.ds K slicing), f32.
    out = jax.block_until_ready(
        d_forward(x, params, tb=8, tk=128, w1_resident=True,
                  compute_dtype=jnp.float32))
    assert jnp.allclose(out, ref, atol=1e-4, rtol=1e-4), "kslice f32 mismatch"

    # 3) Streamed w1 (K-outer grid, persistent full-batch accumulator), f32.
    out = jax.block_until_ready(
        d_forward(x, params, tb=8, tk=128, w1_resident=False,
                  compute_dtype=jnp.float32))
    assert jnp.allclose(out, ref, atol=1e-4, rtol=1e-4), "wstream f32 mismatch"

    # 4) Non-divisible batch / indim exercise the zero-padding, f32.
    B2, indim2 = 10, 200
    x2 = jax.random.normal(kx, (B2, indim2), jnp.float32)
    params2 = init_params(kp, indim2, hdim=hdim)
    ref2 = d_forward_ref(x2, params2)
    out2 = jax.block_until_ready(
        d_forward(x2, params2, tk=128, compute_dtype=jnp.float32))
    assert out2.shape == (B2, 1)
    assert jnp.allclose(out2, ref2, atol=1e-4, rtol=1e-4), "padded f32 mismatch"

    # 5) Default bf16 MXU operands (f32 accumulation) -> loose check.
    out_bf16 = jax.block_until_ready(d_forward(x, params))
    assert out_bf16.shape == (B, 1)
    assert jnp.allclose(out_bf16, ref, atol=1e-1, rtol=1e-1), "bf16 mismatch"

    print("KERNEL_OK")
</pallas_src>

<mosaic_0001>
module attributes {stable_mosaic.version = 11 : i64} {
  func.func @_d_kernel_fused(%arg0: i32, %arg1: memref<16x256xf32, #tpu.memory_space<vmem>>, %arg2: memref<256x128xf32, #tpu.memory_space<vmem>>, %arg3: memref<1x128xf32, #tpu.memory_space<vmem>>, %arg4: memref<128x64xf32, #tpu.memory_space<vmem>>, %arg5: memref<1x64xf32, #tpu.memory_space<vmem>>, %arg6: memref<64x128xf32, #tpu.memory_space<vmem>>, %arg7: memref<1x128xf32, #tpu.memory_space<vmem>>, %arg8: memref<1x128xf32, #tpu.memory_space<vmem>>, %arg9: memref<1x1xf32, #tpu.memory_space<vmem>>, %arg10: memref<16x1xf32, #tpu.memory_space<vmem>>) attributes {dimension_semantics = [#tpu.dimension_semantics<parallel>], iteration_bounds = array<i64: 1>, scalar_prefetch = 0 : i64, scratch_operands = 0 : i64, tpu.core_type = #tpu.core_type<tc>, window_params = [{transform_indices = @transform_0, window_bounds = array<i64: 16, 256>}, {pipeline_mode = #tpu.pipeline_mode<synchronous>, transform_indices = @transform_1, window_bounds = array<i64: 256, 128>}, {pipeline_mode = #tpu.pipeline_mode<synchronous>, transform_indices = @transform_2, window_bounds = array<i64: 1, 128>}, {pipeline_mode = #tpu.pipeline_mode<synchronous>, transform_indices = @transform_3, window_bounds = array<i64: 128, 64>}, {pipeline_mode = #tpu.pipeline_mode<synchronous>, transform_indices = @transform_4, window_bounds = array<i64: 1, 64>}, {pipeline_mode = #tpu.pipeline_mode<synchronous>, transform_indices = @transform_5, window_bounds = array<i64: 64, 128>}, {pipeline_mode = #tpu.pipeline_mode<synchronous>, transform_indices = @transform_6, window_bounds = array<i64: 1, 128>}, {pipeline_mode = #tpu.pipeline_mode<synchronous>, transform_indices = @transform_7, window_bounds = array<i64: 1, 128>}, {pipeline_mode = #tpu.pipeline_mode<synchronous>, transform_indices = @transform_8, window_bounds = array<i64: 1, 1>}, {transform_indices = @transform_9, window_bounds = array<i64: 16, 1>}]} {
    %c0 = arith.constant 0 : index
    %c0_0 = arith.constant 0 : index
    %0 = vector.load %arg1[%c0, %c0_0] : memref<16x256xf32, #tpu.memory_space<vmem>>, vector<16x256xf32>
    %c0_1 = arith.constant 0 : index
    %c0_2 = arith.constant 0 : index
    %1 = vector.load %arg2[%c0_1, %c0_2] : memref<256x128xf32, #tpu.memory_space<vmem>>, vector<256x128xf32>
    %cst = arith.constant dense<0.000000e+00> : vector<16x128xf32>
    %2 = tpu.matmul %0, %1, %cst {dimension_numbers = #tpu.dot_dimension_numbers<[1], [0], [0], [1], [0, 0, 1, 1], [], []>} : vector<16x256xf32>, vector<256x128xf32>, vector<16x128xf32> -> vector<16x128xf32>
    %c0_3 = arith.constant 0 : index
    %c0_4 = arith.constant 0 : index
    %3 = vector.load %arg3[%c0_3, %c0_4] : memref<1x128xf32, #tpu.memory_space<vmem>>, vector<1x128xf32>
    %4 = vector.broadcast %3 : vector<1x128xf32> to vector<16x128xf32>
    %5 = arith.addf %2, %4 : vector<16x128xf32>
    %cst_5 = arith.constant 0.000000e+00 : f32
    %6 = vector.broadcast %cst_5 : f32 to vector<16x128xf32>
    %7 = arith.cmpf oge, %5, %6 : vector<16x128xf32>
    %cst_6 = arith.constant 0.00999999977 : f32
    %8 = vector.broadcast %cst_6 : f32 to vector<16x128xf32>
    %9 = arith.mulf %8, %5 : vector<16x128xf32>
    %10 = arith.select %7, %5, %9 : vector<16x128xi1>, vector<16x128xf32>
    %c0_7 = arith.constant 0 : index
    %c0_8 = arith.constant 0 : index
    %11 = vector.load %arg4[%c0_7, %c0_8] : memref<128x64xf32, #tpu.memory_space<vmem>>, vector<128x64xf32>
    %cst_9 = arith.constant dense<0.000000e+00> : vector<16x64xf32>
    %12 = tpu.matmul %10, %11, %cst_9 {dimension_numbers = #tpu.dot_dimension_numbers<[1], [0], [0], [1], [0, 0, 1, 1], [], []>} : vector<16x128xf32>, vector<128x64xf32>, vector<16x64xf32> -> vector<16x64xf32>
    %c0_10 = arith.constant 0 : index
    %c0_11 = arith.constant 0 : index
    %13 = vector.load %arg5[%c0_10, %c0_11] : memref<1x64xf32, #tpu.memory_space<vmem>>, vector<1x64xf32>
    %14 = vector.broadcast %13 : vector<1x64xf32> to vector<16x64xf32>
    %15 = arith.addf %12, %14 : vector<16x64xf32>
    %cst_12 = arith.constant 0.000000e+00 : f32
    %16 = vector.broadcast %cst_12 : f32 to vector<16x64xf32>
    %17 = arith.cmpf oge, %15, %16 : vector<16x64xf32>
    %cst_13 = arith.constant 0.00999999977 : f32
    %18 = vector.broadcast %cst_13 : f32 to vector<16x64xf32>
    %19 = arith.mulf %18, %15 : vector<16x64xf32>
    %20 = arith.select %17, %15, %19 : vector<16x64xi1>, vector<16x64xf32>
    %c0_14 = arith.constant 0 : index
    %c0_15 = arith.constant 0 : index
    %21 = vector.load %arg6[%c0_14, %c0_15] : memref<64x128xf32, #tpu.memory_space<vmem>>, vector<64x128xf32>
    %cst_16 = arith.constant dense<0.000000e+00> : vector<16x128xf32>
    %22 = tpu.matmul %20, %21, %cst_16 {dimension_numbers = #tpu.dot_dimension_numbers<[1], [0], [0], [1], [0, 0, 1, 1], [], []>} : vector<16x64xf32>, vector<64x128xf32>, vector<16x128xf32> -> vector<16x128xf32>
    %c0_17 = arith.constant 0 : index
    %c0_18 = arith.constant 0 : index
    %23 = vector.load %arg7[%c0_17, %c0_18] : memref<1x128xf32, #tpu.memory_space<vmem>>, vector<1x128xf32>
    %24 = vector.broadcast %23 : vector<1x128xf32> to vector<16x128xf32>
    %25 = arith.addf %22, %24 : vector<16x128xf32>
    %cst_19 = arith.constant 0.000000e+00 : f32
    %26 = vector.broadcast %cst_19 : f32 to vector<16x128xf32>
    %27 = arith.cmpf oge, %25, %26 : vector<16x128xf32>
    %cst_20 = arith.constant 0.00999999977 : f32
    %28 = vector.broadcast %cst_20 : f32 to vector<16x128xf32>
    %29 = arith.mulf %28, %25 : vector<16x128xf32>
    %30 = arith.select %27, %25, %29 : vector<16x128xi1>, vector<16x128xf32>
    %c0_21 = arith.constant 0 : index
    %c0_22 = arith.constant 0 : index
    %31 = vector.load %arg8[%c0_21, %c0_22] : memref<1x128xf32, #tpu.memory_space<vmem>>, vector<1x128xf32>
    %32 = vector.broadcast %31 : vector<1x128xf32> to vector<16x128xf32>
    %33 = arith.mulf %30, %32 : vector<16x128xf32>
    %cst_23 = arith.constant dense<0.000000e+00> : vector<16xf32>
    %34 = vector.multi_reduction <add>, %33, %cst_23 [1] : vector<16x128xf32> to vector<16xf32>
    %35 = vector.shape_cast %34 : vector<16xf32> to vector<16x1xf32>
    %c0_24 = arith.constant 0 : index
    %c0_25 = arith.constant 0 : index
    %36 = vector.load %arg9[%c0_24, %c0_25] : memref<1x1xf32, #tpu.memory_space<vmem>>, vector<1x1xf32>
    %37 = vector.broadcast %36 : vector<1x1xf32> to vector<16x1xf32>
    %38 = arith.addf %35, %37 : vector<16x1xf32>
    %39 = arith.negf %38 : vector<16x1xf32>
    %40 = math.exp %39 : vector<16x1xf32>
    %cst_26 = arith.constant 1.000000e+00 : f32
    %41 = vector.broadcast %cst_26 : f32 to vector<16x1xf32>
    %42 = arith.addf %41, %40 : vector<16x1xf32>
    %43 = arith.divf %41, %42 : vector<16x1xf32>
    %c0_27 = arith.constant 0 : index
    %c0_28 = arith.constant 0 : index
    %44 = vector.load %arg10[%c0_27, %c0_28] : memref<16x1xf32, #tpu.memory_space<vmem>>, vector<16x1xf32>
    tpu.vector_store %arg10[%c0_27, %c0_28], %43 {strides = array<i32>} : memref<16x1xf32, #tpu.memory_space<vmem>>, vector<16x1xf32>,
    return
  }
  func.func @transform_0(%arg0: i32) -> (i32, i32) {
    %c0_i32 = arith.constant 0 : i32
    %c0_i32_0 = arith.constant 0 : i32
    return %arg0, %c0_i32 : i32, i32
  }
  func.func @transform_1(%arg0: i32) -> (i32, i32) {
    %c0_i32 = arith.constant 0 : i32
    %c0_i32_0 = arith.constant 0 : i32
    %c0_i32_1 = arith.constant 0 : i32
    return %c0_i32, %c0_i32_0 : i32, i32
  }
  func.func @transform_2(%arg0: i32) -> (i32, i32) {
    %c0_i32 = arith.constant 0 : i32
    %c0_i32_0 = arith.constant 0 : i32
    %c0_i32_1 = arith.constant 0 : i32
    return %c0_i32, %c0_i32_0 : i32, i32
  }
  func.func @transform_3(%arg0: i32) -> (i32, i32) {
    %c0_i32 = arith.constant 0 : i32
    %c0_i32_0 = arith.constant 0 : i32
    %c0_i32_1 = arith.constant 0 : i32
    return %c0_i32, %c0_i32_0 : i32, i32
  }
  func.func @transform_4(%arg0: i32) -> (i32, i32) {
    %c0_i32 = arith.constant 0 : i32
    %c0_i32_0 = arith.constant 0 : i32
    %c0_i32_1 = arith.constant 0 : i32
    return %c0_i32, %c0_i32_0 : i32, i32
  }
  func.func @transform_5(%arg0: i32) -> (i32, i32) {
    %c0_i32 = arith.constant 0 : i32
    %c0_i32_0 = arith.constant 0 : i32
    %c0_i32_1 = arith.constant 0 : i32
    return %c0_i32, %c0_i32_0 : i32, i32
  }
  func.func @transform_6(%arg0: i32) -> (i32, i32) {
    %c0_i32 = arith.constant 0 : i32
    %c0_i32_0 = arith.constant 0 : i32
    %c0_i32_1 = arith.constant 0 : i32
    return %c0_i32, %c0_i32_0 : i32, i32
  }
  func.func @transform_7(%arg0: i32) -> (i32, i32) {
    %c0_i32 = arith.constant 0 : i32
    %c0_i32_0 = arith.constant 0 : i32
    %c0_i32_1 = arith.constant 0 : i32
    return %c0_i32, %c0_i32_0 : i32, i32
  }
  func.func @transform_8(%arg0: i32) -> (i32, i32) {
    %c0_i32 = arith.constant 0 : i32
    %c0_i32_0 = arith.constant 0 : i32
    %c0_i32_1 = arith.constant 0 : i32
    return %c0_i32, %c0_i32_0 : i32, i32
  }
  func.func @transform_9(%arg0: i32) -> (i32, i32) {
    %c0_i32 = arith.constant 0 : i32
    %c0_i32_0 = arith.constant 0 : i32
    return %arg0, %c0_i32 : i32, i32
  }
}

</mosaic_0001>

<bundles_post_ra>
// kernel: tpu_custom_call.1
= control target key start
LH: loop header
LB: loop body
LE: loop exit
PB: predicated region body
PF: predicated region fallthrough
CT: control target
= control target key end

     0   :  { %s835_s0 = inlined_call_operand.vmem [shape: f32[16,256], index: 0, kind: input, shape index: {}]   ;;  %s836_s1 = inlined_call_operand.hbm [shape: f32[256,128], index: 1, kind: input, shape index: {}]   ;;  %s837_s2 = inlined_call_operand.vmem [shape: f32[1,128], index: 2, kind: input, shape index: {}]   ;;  %s838_s3 = inlined_call_operand.vmem [shape: f32[128,64], index: 3, kind: input, shape index: {}]   ;;  %s839_s4 = inlined_call_operand.vmem [shape: f32[1,64], index: 4, kind: input, shape index: {}]   ;;  %s840_s5 = inlined_call_operand.vmem [shape: f32[64,128], index: 5, kind: input, shape index: {}]   ;;  %s841_s6 = inlined_call_operand.vmem [shape: f32[1,128], index: 6, kind: input, shape index: {}]   ;;  %s842_s7 = inlined_call_operand.vmem [shape: f32[1,128], index: 7, kind: input, shape index: {}]   ;;  %s843_s8 = inlined_call_operand.<no memory space> [shape: f32[1,1], index: 8, kind: input, shape index: {}]   ;;  %s844_s9 = inlined_call_operand.vmem [shape: f32[16,1], index: 9, kind: output, shape index: {}]  }
   0x1   :  { %v14_v0 = vstv %s843_s8 }
   0x2   :  { %15 = vst [vmem:[#allocation2] sm:$0x1] %v14_v0 }
   0x3   :  { %16 = vsyncpa [#allocation4], 0  ;;  %s665_s11 = smov [#allocation3]   ;;  %s641_s15 = scalar_lea.hbm %s836_s1, 4096 }
   0x4   :  { %s24_s12 = sshll.u32 %s665_s11, 4  ;;  %p642_p0 = scmp.ne.s32.totalorder %s836_s1, %s641_s15  ;;  %s25_s12 = int_to_ptr.vmem [resolvable:$true] %s24_s12 }
   0x5   :  { %p645_p1 = scmp.lt.u32.totalorder %s641_s15, %s836_s1 }
   0x7   :  { %p647_p2 = pnand %p645_p1, %p642_p0 }
   0x9   :  { %650 = shalt.err (!%p647_p2)
}
   0xa   :  { %s651_s8 = scalar_lea.vmem %s25_s12, 4096  ;;  %p656_p4 = scmp.lt.s32.totalorder %s25_s12, %s25_s12 }
   0xb   :  { %p652_p3 = scmp.ne.s32.totalorder %s25_s12, %s651_s8  ;;  %p657_p5 = scmp.lt.s32.totalorder %s651_s8, %s651_s8 }
   0xd   :  { %p658_p6 = por %p657_p5, %p656_p4 }
   0xf   :  { %p659_p7 = pnand %p658_p6, %p652_p3 }
  0x11   :  { %662 = shalt.err (!%p659_p7)
}
  0x12   :  { %s666_s20 = smov 128   ;;  %s667_s21 = smov 8  }
  0x13   :  { %30 = dma.hbm_to_vmem [thread:$0]  %s836_s1, 4096, %s25_s12, [#allocation4], %s666_s20, %s666_s20, %s667_s21  }
  0x14   :  { %663 = dma.done.wait [#allocation4], 4096  }
  0x15   :  { %664 = vsyncadd [#allocation4], 4294963200  ;;  %v68_v1 = vld [vmem:[#allocation3 + $0x80] sm:$0xff]  ;;  %v69_v2 = vld [vmem:[#allocation3 + $0x88] sm:$0xff]  ;;  %vm291_vm4 = vcmask 523264   ;;  %vm413_vm7 = vcmask 7168  }
  0x16   :  { %v52_v3 = vld [vmem:[#allocation3] sm:$0xff]  ;;  %v550_v4 = vpack.c.bf16 %v69_v2, %v68_v1  ;;  %v53_v5 = vld [vmem:[#allocation3 + $0x8] sm:$0xff]  ;;  %v70_v6 = vld [vmem:[#allocation3 + $0x90] sm:$0xff] }
  0x17   :  { %v71_v7 = vld [vmem:[#allocation3 + $0x98] sm:$0xff]  ;;  %v552_v8 = vpack.c.bf16 %v53_v5, %v52_v3  ;;  %v54_v10 = vld [vmem:[#allocation3 + $0x10] sm:$0xff]  ;;  %v72_v12 = vld [vmem:[#allocation3 + $0xa0] sm:$0xff] }
  0x18   :  { %v554_v9 = vpack.c.bf16 %v71_v7, %v70_v6  ;;  %v55_v11 = vld [vmem:[#allocation3 + $0x18] sm:$0xff]  ;;  %551 = vmatprep.subr.bf16.mxu0 %v550_v4  ;;  %v73_v13 = vld [vmem:[#allocation3 + $0xa8] sm:$0xff]  ;;  %v56_v16 = vld [vmem:[#allocation3 + $0x20] sm:$0xff] }
  0x19   :  { %553 = vmatpush3.bf16.msra.mxu0 %v552_v8  ;;  %v556_v14 = vpack.c.bf16 %v55_v11, %v54_v10  ;;  %v558_v15 = vpack.c.bf16 %v73_v13, %v72_v12  ;;  %v57_v17 = vld [vmem:[#allocation3 + $0x28] sm:$0xff]  ;;  %v74_v18 = vld [vmem:[#allocation3 + $0xb0] sm:$0xff]  ;;  %v75_v19 = vld [vmem:[#allocation3 + $0xb8] sm:$0xff] }
  0x1a   :  { %555 = vmatprep.subr.bf16.mxu0 %v554_v9  ;;  %v560_v20 = vpack.c.bf16 %v57_v17, %v56_v16  ;;  %v562_v21 = vpack.c.bf16 %v75_v19, %v74_v18  ;;  %v58_v22 = vld [vmem:[#allocation3 + $0x30] sm:$0xff]  ;;  %v59_v23 = vld [vmem:[#allocation3 + $0x38] sm:$0xff]  ;;  %v76_v24 = vld [vmem:[#allocation3 + $0xc0] sm:$0xff] }
  0x1b   :  { %v77_v25 = vld [vmem:[#allocation3 + $0xc8] sm:$0xff]  ;;  %v60_v27 = vld [vmem:[#allocation3 + $0x40] sm:$0xff]  ;;  %v564_v28 = vpack.c.bf16 %v59_v23, %v58_v22  ;;  %v78_v34 = vld [vmem:[#allocation3 + $0xd0] sm:$0xff] }
  0x1c   :  { %v49_v26 = vld [vmem:[%s835_s0 + $0x8] sm:$0xff]  ;;  %v172_v29 = vld [vmem:[%s838_s3] sm:$0xff]  ;;  %v174_v31 = vld [vmem:[%s838_s3 + $0x10] sm:$0xff]  ;;  %v566_v32 = vpack.c.bf16 %v77_v25, %v76_v24 }
  0x1d   :  { %557 = vmatpush3.bf16.msra.mxu0 %v556_v14  ;;  %155 = vmatprep.mubr.f32.mxu0 %v49_v26  ;;  %v173_v30 = vld [vmem:[%s838_s3 + $0x8] sm:$0xff]  ;;  %v175_v36 = vld [vmem:[%s838_s3 + $0x18] sm:$0xff]  ;;  %v176_v39 = vld [vmem:[%s838_s3 + $0x20] sm:$0xff] }
  0x1e   :  { %559 = vmatprep.subr.bf16.mxu0 %v558_v15  ;;  %v61_v33 = vld [vmem:[#allocation3 + $0x48] sm:$0xff]  ;;  %v582_v35 = vpack.c.bf16 %v173_v30, %v172_v29  ;;  %v79_v37 = vld [vmem:[#allocation3 + $0xd8] sm:$0xff]  ;;  %v586_v38 = vpack.c.bf16 %v175_v36, %v174_v31  ;;  %v62_v43 = vld [vmem:[#allocation3 + $0x50] sm:$0xff] }
  0x1f   :  { %v177_v40 = vld [vmem:[%s838_s3 + $0x28] sm:$0xff]  ;;  %v568_v41 = vpack.c.bf16 %v61_v33, %v60_v27  ;;  %v570_v42 = vpack.c.bf16 %v79_v37, %v78_v34  ;;  %v63_v44 = vld [vmem:[#allocation3 + $0x58] sm:$0xff]  ;;  %v178_v48 = vld [vmem:[%s838_s3 + $0x30] sm:$0xff] }
  0x20   :  { %583 = vmatprep.subr.bf16.mxu1 %v582_v35  ;;  %v80_v45 = vld [vmem:[#allocation3 + $0xe0] sm:$0xff]  ;;  %v590_v46 = vpack.c.bf16 %v177_v40, %v176_v39  ;;  %v81_v47 = vld [vmem:[#allocation3 + $0xe8] sm:$0xff]  ;;  %v179_v49 = vld [vmem:[%s838_s3 + $0x38] sm:$0xff]  ;;  %v572_v50 = vpack.c.bf16 %v63_v44, %v62_v43 }
  0x21   :  { %561 = vmatpush3.bf16.msra.mxu0 %v560_v20  ;;  %585 = vmatpush3.bf16.msra.mxu1 %v582_v35  ;;  %v574_v51 = vpack.c.bf16 %v81_v47, %v80_v45  ;;  %v64_v52 = vld [vmem:[#allocation3 + $0x60] sm:$0xff]  ;;  %v65_v53 = vld [vmem:[#allocation3 + $0x68] sm:$0xff]  ;;  %v82_v54 = vld [vmem:[#allocation3 + $0xf0] sm:$0xff]  ;;  %v594_v55 = vpack.c.bf16 %v179_v49, %v178_v48 }
  0x22   :  { %563 = vmatprep.subr.bf16.mxu0 %v562_v21  ;;  %587 = vmatprep.subr.bf16.mxu1 %v586_v38  ;;  %v83_v56 = vld [vmem:[#allocation3 + $0xf8] sm:$0xff]  ;;  %v181_v58 = vld [vmem:[%s838_s3 + $0x48] sm:$0xff]  ;;  %v576_v59 = vpack.c.bf16 %v65_v53, %v64_v52  ;;  %v66_v61 = vld [vmem:[#allocation3 + $0x70] sm:$0xff] }
  0x23   :  { %v180_v57 = vld [vmem:[%s838_s3 + $0x40] sm:$0xff]  ;;  %v578_v60 = vpack.c.bf16 %v83_v56, %v82_v54  ;;  %v51_v2 = vld [vmem:[%s835_s0 + $0x18] sm:$0xff]  ;;  %v50_v3 = vld [vmem:[%s835_s0 + $0x10] sm:$0xff] }
  0x24   :  { %v67_v62 = vld [vmem:[#allocation3 + $0x78] sm:$0xff]  ;;  %v598_v63 = vpack.c.bf16 %v181_v58, %v180_v57  ;;  %v182_v4 = vld [vmem:[%s838_s3 + $0x50] sm:$0xff]  ;;  %v185_v8 = vld [vmem:[%s838_s3 + $0x68] sm:$0xff] }
  0x25   :  { %565 = vmatpush3.bf16.msra.mxu0 %v564_v28  ;;  %589 = vmatpush3.bf16.msra.mxu1 %v586_v38  ;;  %v580_v0 = vpack.c.bf16 %v67_v62, %v66_v61  ;;  %v48_v1 = vld [vmem:[%s835_s0] sm:$0xff]  ;;  %v183_v5 = vld [vmem:[%s838_s3 + $0x58] sm:$0xff]  ;;  %v186_v10 = vld [vmem:[%s838_s3 + $0x70] sm:$0xff] }
  0x26   :  { %567 = vmatprep.subr.bf16.mxu0 %v566_v32  ;;  %591 = vmatprep.subr.bf16.mxu1 %v590_v46  ;;  %v602_v6 = vpack.c.bf16 %v183_v5, %v182_v4  ;;  %v184_v7 = vld [vmem:[%s838_s3 + $0x60] sm:$0xff]  ;;  %v187_v11 = vld [vmem:[%s838_s3 + $0x78] sm:$0xff]  ;;  %v277_v14 = vld [vmem:[%s840_s5 + $0x8] sm:$0xff] }
  0x27   :  { %v606_v9 = vpack.c.bf16 %v185_v8, %v184_v7  ;;  %v610_v12 = vpack.c.bf16 %v187_v11, %v186_v10  ;;  %v276_v13 = vld [vmem:[%s840_s5] sm:$0xff]  ;;  %v278_v15 = vld [vmem:[%s840_s5 + $0x10] sm:$0xff]  ;;  %v279_v17 = vld [vmem:[%s840_s5 + $0x18] sm:$0xff] }
  0x28   :  { %v614_v16 = vpack.c.bf16 %v277_v14, %v276_v13  ;;  %v618_v18 = vpack.c.bf16 %v279_v17, %v278_v15  ;;  %v421_v20 = vld [vmem:[%s837_s2] ss:$0 sm:$0xff]  ;;  %v281_v33 = vld [vmem:[%s840_s5 + $0x28] sm:$0xff]  ;;  %v282_v35 = vld [vmem:[%s840_s5 + $0x30] sm:$0xff] }
  0x29   :  { %569 = vmatpush3.bf16.msra.mxu0 %v568_v41  ;;  %593 = vmatpush3.bf16.msra.mxu1 %v590_v46  ;;  %v280_v32 = vld [vmem:[%s840_s5 + $0x20] sm:$0xff]  ;;  %v283_v36 = vld [vmem:[%s840_s5 + $0x38] sm:$0xff] }
  0x2a   :  { %571 = vmatprep.subr.bf16.mxu0 %v570_v42  ;;  %595 = vmatprep.subr.bf16.mxu1 %v594_v55  ;;  %v622_v34 = vpack.c.bf16 %v281_v33, %v280_v32  ;;  %v626_v37 = vpack.c.bf16 %v283_v36, %v282_v35  ;;  %v422_v38 = vld [vmem:[%s839_s4] ss:$0 sm:$0xff] }
  0x2b   :  { %v423_v47 = vld [vmem:[%s841_s6] ss:$0 sm:$0xff] }
  0x2c   :  { %v426_v52 = vld [vmem:[%s842_s7] ss:$0 sm:$0xff] }
  0x2d   :  { %573 = vmatpush3.bf16.msra.mxu0 %v572_v50  ;;  %597 = vmatpush3.bf16.msra.mxu1 %v594_v55 }
  0x2e   :  { %575 = vmatprep.subr.bf16.mxu0 %v574_v51  ;;  %599 = vmatprep.subr.bf16.mxu1 %v598_v63 }
  0x31   :  { %577 = vmatpush3.bf16.msra.mxu0 %v576_v59  ;;  %601 = vmatpush3.bf16.msra.mxu1 %v598_v63  ;;  %v427_v59 = vld [vmem:[#allocation2] ss:$0 sm:$0xff] }
  0x32   :  { %579 = vmatprep.subr.bf16.mxu0 %v578_v60  ;;  %603 = vmatprep.subr.bf16.mxu1 %v602_v6 }
  0x35   :  { %581 = vmatpush3.bf16.msra.mxu0 %v580_v0  ;;  %605 = vmatpush3.bf16.msra.mxu1 %v602_v6 }
  0x36   :  { %607 = vmatprep.subr.bf16.mxu1 %v606_v9  ;;  %615 = vmatprep.subr.bf16.mxu0 %v614_v16 }
  0x38   :  { %156 = vmatmul.mubr.f32.vlgmr.msra.gmra.mrb[0].mxu0 %v48_v1 }
  0x39   :  { %160 = vmatprep.mubr.f32.mxu0 %v51_v2  ;;  %609 = vmatpush3.bf16.msra.mxu1 %v606_v9 }
  0x3a   :  { %611 = vmatprep.subr.bf16.mxu1 %v610_v12  ;;  %617 = vmatpush3.bf16.msra.mxu0 %v614_v16 }
  0x3b   :  { %619 = vmatprep.subr.bf16.mxu0 %v618_v18 }
  0x3c   :  { %161 = vmatmul.mubr.f32.gmra.mrb[2].mxu0 %v50_v3 }
  0x3d   :  { %613 = vmatpush3.bf16.msra.mxu1 %v610_v12 }
  0x3e   :  { %621 = vmatpush3.bf16.msra.mxu0 %v618_v18 }
  0x3f   :  { %623 = vmatprep.subr.bf16.mxu0 %v622_v34 }
  0x42   :  { %625 = vmatpush3.bf16.msra.mxu0 %v622_v34 }
  0x43   :  { %627 = vmatprep.subr.bf16.mxu0 %v626_v37 }
  0x46   :  { %629 = vmatpush3.bf16.msra.mxu0 %v626_v37 }
 0x10b   :  { %v462_v19 = vpop.f32.mrb[0].mxu0 }
 0x10c   :  { %v463_v21 = vpop.f32.mrb[1].mxu0 }
 0x10d   :  { %v464_v22 = vadd.f32 %v463_v21, %v462_v19 }
 0x10f   :  { %v158_v23 = vadd.f32 %v464_v22, %v421_v20  ;;  %v465_v24 = vpop.f32.mrb[2].mxu0 }
 0x110   :  { %v466_v25 = vpop.f32.mrb[3].mxu0 }
 0x111   :  { %v467_v26 = vadd.f32 %v466_v25, %v465_v24  ;;  %vm166_vm0 = vcmp.ge.f32.partialorder %v158_v23, 0.0  ;;  %v168_v27 = vmul.f32 0.01, %v158_v23 }
 0x113   :  { %v163_v28 = vadd.f32 %v467_v26, %v421_v20  ;;  %v170_v29 = vsel %vm166_vm0, %v158_v23, %v168_v27 }
 0x114   :  { %528 = vmatprep.mubr.f32.mxu1 %v170_v29 }
 0x115   :  { %vm167_vm1 = vcmp.ge.f32.partialorder %v163_v28, 0.0  ;;  %v169_v30 = vmul.f32 0.01, %v163_v28 }
 0x117   :  { %v171_v31 = vsel %vm167_vm1, %v163_v28, %v169_v30 }
 0x118   :  { %529 = vmatmul.mubr.f32.vlgmr.msra.gmra.mrb[0].mxu1 %v171_v31 }
 0x1eb   :  { %v530_v39 = vpop.f32.mrb[0].mxu1 }
 0x1ec   :  { %v267_v40 = vadd.f32 %v530_v39, %v422_v38  ;;  %v261_v41 = vpop.f32.mrb[1].mxu1 }
 0x1ed   :  { %v262_v42 = vadd.f32 %v422_v38, %v261_v41 }
 0x1ee   :  { %v273_v43 = vmul.f32 0.01, %v267_v40  ;;  %vm271_vm2 = vcmp.ge.f32.partialorder %v267_v40, 0.0 }
 0x1ef   :  { %vm270_vm3 = vcmp.ge.f32.partialorder %v262_v42, 0.0  ;;  %v272_v44 = vmul.f32 0.01, %v262_v42 }
 0x1f0   :  { %v275_v46 = vsel %vm271_vm2, %v267_v40, %v273_v43 }
 0x1f1   :  { %v274_v45 = vsel %vm270_vm3, %v262_v42, %v272_v44 }
 0x1f2   :  { %547 = vmatprep.mubr.msk.f32.mxu0 %vm291_vm4, %v274_v45 }
 0x1f3   :  { %548 = vmatmul.mubr.msk.f32.vlgmr.msra.gmra.mrb[4].mxu0 %vm291_vm4, %v275_v46 }
 0x2c6   :  { %v549_v48 = vpop.f32.mrb[4].mxu0 }
 0x2c7   :  { %v370_v49 = vadd.f32 %v549_v48, %v423_v47  ;;  %v364_v50 = vpop.f32.mrb[5].mxu0 }
 0x2c8   :  { %v365_v51 = vadd.f32 %v423_v47, %v364_v50 }
 0x2c9   :  { %v376_v53 = vmul.f32 0.01, %v370_v49  ;;  %vm374_vm6 = vcmp.ge.f32.partialorder %v370_v49, 0.0 }
 0x2ca   :  { %v375_v54 = vmul.f32 0.01, %v365_v51  ;;  %vm373_vm5 = vcmp.ge.f32.partialorder %v365_v51, 0.0 }
 0x2cb   :  { %v378_v57 = vsel %vm374_vm6, %v370_v49, %v376_v53 }
 0x2cc   :  { %v377_v55 = vsel %vm373_vm5, %v365_v51, %v375_v54  ;;  %v387_v58 = vmul.f32 %v426_v52, %v378_v57 }
 0x2cd   :  { %v386_v56 = vmul.f32 %v426_v52, %v377_v55 }
 0x2cf   :  { %388 = vadd.xlane.f32.xlu0 %v386_v56 }
 0x2d3   :  { %390 = vadd.xlane.f32.xlu0 %v387_v58 }
 0x35c   :  { %v389_v60 = vpop.xlane.xlu0 %388 }
 0x35d   :  { %v399_v61 = vadd.f32 %v427_v59, %v389_v60 }
 0x35f   :  { %v428_v62 = vmul.f32 -1.442695, %v399_v61 }
 0x360   :  { %v391_v63 = vpop.xlane.xlu0 %390 }
 0x361   :  { %633 = vpow2.f32 %v428_v62  ;;  %v400_v0 = vadd.f32 %v427_v59, %v391_v63 }
 0x363   :  { %v429_v1 = vmul.f32 -1.442695, %v400_v0 }
 0x365   :  { %635 = vpow2.f32 %v429_v1 }
 0x36b   :  { %v634_v2 = vpop.eup %633 }
 0x36c   :  { %v407_v3 = vadd.f32 1.0, %v634_v2 }
 0x36e   :  { %637 = vrcp.f32 %v407_v3 }
 0x36f   :  { %v636_v4 = vpop.eup %635 }
 0x370   :  { %v408_v5 = vadd.f32 1.0, %v636_v4 }
 0x372   :  { %639 = vrcp.f32 %v408_v5 }
 0x378   :  { %v638_v6 = vpop.eup %637 }
 0x379   :  { %414 = vst.msk [vmem:[%s844_s9] sm:$0xff] %vm413_vm7, %v638_v6 }
 0x37c   :  { %v640_v7 = vpop.eup %639 }
 0x37d   :  { %415 = vst.msk [vmem:[%s844_s9 + $0x8] sm:$0xff] %vm413_vm7, %v640_v7 }
 0x37e   :  { %420 = vsyncpa [#allocation4], 1 }

</bundles_post_ra>
